<compile_context>
chip_gen: v7x
topology: tpu7x:2x2x1
jax: 0.10.0
libtpu: 0.0.40
codegen_flags: <defaults>
</compile_context>

<pallas_src>
import functools

import jax
import jax.numpy as jnp
from jax.experimental import pallas as pl
from jax.experimental.pallas import tpu as pltpu

EPS = 1e-12  # F.normalize default eps


def _round_up(n, m):
    return (n + m - 1) // m * m


def _prenorm_res_kernel(x_ref, w_ref, b_ref, o_ref, *, compute_dtype):
    # x_ref: (1, C, T) tile (channels on sublanes, spatial on lanes)
    # w_ref: (C, C)    conv weight with g*sqrt(C) pre-folded into input channels
    # b_ref: (C, 1)    bias
    x = x_ref[0].astype(jnp.float32)                       # (C, T)

    # F.normalize(x, dim=channel):  x * rsqrt(max(sum(x^2), eps^2))
    sq = jnp.sum(x * x, axis=0, keepdims=True)             # (1, T) sublane reduce
    inv = jax.lax.rsqrt(jnp.maximum(sq, EPS * EPS))        # one EUP op per pixel
    y = x * inv                                            # (C, T)

    # fn: 1x1 conv over channels -> (C_out, T) matmul + bias (f32 accumulate)
    f = jnp.dot(w_ref[...].astype(compute_dtype),
                y.astype(compute_dtype),
                preferred_element_type=jnp.float32)        # (C, T)
    f = f + b_ref[...].astype(jnp.float32)

    # residual add uses raw x, so folding g*scale into w is exact
    o_ref[0] = (f + x).astype(o_ref.dtype)


def prenorm_res(x_nchw, g, w, b, *, vmem_budget_bytes=40 * 2**20):
    """x_nchw: [B, C, H, W]; g: [C]; w: [C_out, C_in]; b: [C_out]."""
    B, C, H, W = x_nchw.shape
    HW = H * W
    scale = float(C) ** 0.5

    # Fold RMSNorm gain and sqrt(C) scale into the conv weight (input channels).
    w_scaled = (w * (g * scale)[None, :]).astype(w.dtype)  # (C_out, C_in)
    b2 = b.reshape(C, 1)

    # Free (metadata-only) reshape: NCHW -> [B, C, H*W].  No transposes.
    x3 = x_nchw.reshape(B, C, HW)

    # ---- choose spatial tile size from a VMEM budget (mem-bound op) ----
    itemsize = jnp.dtype(x_nchw.dtype).itemsize
    w_bytes = 2 * C * C * jnp.dtype(w_scaled.dtype).itemsize      # double-buffered
    per_col = 4 * C * itemsize                                    # x + out double-buffers
    avail = max(vmem_budget_bytes - w_bytes - (1 << 20), per_col * 128)
    tile_hw = min(avail // per_col, 4096, _round_up(HW, 128))
    tile_hw = max((tile_hw // 128) * 128, 128)

    # Pad spatial positions to a multiple of tile_hw (padded cols sliced off).
    HW_pad = _round_up(HW, tile_hw)
    if HW_pad != HW:
        x3 = jnp.pad(x3, ((0, 0), (0, 0), (0, HW_pad - HW)))

    compute_dtype = (jnp.bfloat16 if x_nchw.dtype == jnp.bfloat16
                     else jnp.float32)
    kernel = functools.partial(_prenorm_res_kernel, compute_dtype=compute_dtype)

    grid = (B, HW_pad // tile_hw)
    out3 = pl.pallas_call(
        kernel,
        out_shape=jax.ShapeDtypeStruct((B, C, HW_pad), x_nchw.dtype),
        grid_spec=pltpu.PrefetchScalarGridSpec(
            num_scalar_prefetch=0,
            grid=grid,
            in_specs=[
                pl.BlockSpec((1, C, tile_hw), lambda bi, j: (bi, 0, j)),  # x
                pl.BlockSpec((C, C), lambda bi, j: (0, 0)),               # w (folded)
                pl.BlockSpec((C, 1), lambda bi, j: (0, 0)),               # bias
            ],
            out_specs=pl.BlockSpec((1, C, tile_hw), lambda bi, j: (bi, 0, j)),
        ),
        compiler_params=pltpu.CompilerParams(
            dimension_semantics=("parallel", "parallel"),
            vmem_limit_bytes=48 * 2**20),
    )(x3, w_scaled, b2)

    if HW_pad != HW:
        out3 = out3[:, :, :HW]
    return out3.reshape(B, C, H, W)


def _reference(x, g, w, b):
    # Pure-JAX reference of the same math (PyTorch semantics) for sanity check.
    B, C, H, W = x.shape
    scale = float(C) ** 0.5
    nrm = jnp.sqrt(jnp.sum(x * x, axis=1, keepdims=True))
    y = x / jnp.maximum(nrm, EPS) * g.reshape(1, C, 1, 1) * scale
    f = jnp.einsum("bchw,oc->bohw", y, w) + b.reshape(1, C, 1, 1)
    return f + x


if __name__ == "__main__":
    key = jax.random.PRNGKey(0)
    B, C, H, W = 2, 4, 16, 16

    kx, kw, kb = jax.random.split(key, 3)
    x = jax.random.normal(kx, (B, C, H, W), dtype=jnp.float32)

    # Parameters: RMSNorm g initialized to ones (as in the PyTorch __init__);
    # conv weight/bias drawn deterministically from PRNGKey(0) splits.
    g = jnp.ones((C,), dtype=jnp.float32)
    w = jax.random.normal(kw, (C, C), dtype=jnp.float32) * (1.0 / C ** 0.5)
    b = jax.random.normal(kb, (C,), dtype=jnp.float32) * 0.01

    out = jax.block_until_ready(prenorm_res(x, g, w, b))

    ref = _reference(x, g, w, b)
    assert out.shape == (B, C, H, W)
    assert jnp.allclose(out, ref, atol=1e-4, rtol=1e-4), "mismatch vs reference"

    print("KERNEL_OK")
</pallas_src>

<mosaic_0001>
module attributes {stable_mosaic.version = 11 : i64} {
  func.func @_prenorm_res_kernel(%arg0: i32, %arg1: i32, %arg2: memref<1x4x256xf32, #tpu.memory_space<vmem>>, %arg3: memref<4x4xf32, #tpu.memory_space<vmem>>, %arg4: memref<4x1xf32, #tpu.memory_space<vmem>>, %arg5: memref<1x4x256xf32, #tpu.memory_space<vmem>>) attributes {dimension_semantics = [#tpu.dimension_semantics<parallel>, #tpu.dimension_semantics<parallel>], iteration_bounds = array<i64: 2, 1>, scalar_prefetch = 0 : i64, scratch_operands = 0 : i64, tpu.core_type = #tpu.core_type<tc>, window_params = [{transform_indices = @transform_0, window_bounds = array<i64: 1, 4, 256>}, {pipeline_mode = #tpu.pipeline_mode<synchronous>, transform_indices = @transform_1, window_bounds = array<i64: 4, 4>}, {pipeline_mode = #tpu.pipeline_mode<synchronous>, transform_indices = @transform_2, window_bounds = array<i64: 4, 1>}, {transform_indices = @transform_3, window_bounds = array<i64: 1, 4, 256>}]} {
    %c0 = arith.constant 0 : index
    %c0_0 = arith.constant 0 : index
    %c0_1 = arith.constant 0 : index
    %0 = vector.load %arg2[%c0, %c0_0, %c0_1] : memref<1x4x256xf32, #tpu.memory_space<vmem>>, vector<1x4x256xf32>
    %1 = vector.shape_cast %0 : vector<1x4x256xf32> to vector<4x256xf32>
    %2 = arith.mulf %1, %1 : vector<4x256xf32>
    %cst = arith.constant dense<0.000000e+00> : vector<256xf32>
    %3 = vector.multi_reduction <add>, %2, %cst [0] : vector<4x256xf32> to vector<256xf32>
    %4 = vector.shape_cast %3 : vector<256xf32> to vector<1x256xf32>
    %cst_2 = arith.constant 1.000000e-24 : f32
    %5 = vector.broadcast %cst_2 : f32 to vector<1x256xf32>
    %6 = arith.maximumf %4, %5 : vector<1x256xf32>
    %7 = math.rsqrt %6 : vector<1x256xf32>
    %8 = vector.broadcast %7 : vector<1x256xf32> to vector<4x256xf32>
    %9 = arith.mulf %1, %8 : vector<4x256xf32>
    %c0_3 = arith.constant 0 : index
    %c0_4 = arith.constant 0 : index
    %10 = vector.load %arg3[%c0_3, %c0_4] : memref<4x4xf32, #tpu.memory_space<vmem>>, vector<4x4xf32>
    %cst_5 = arith.constant dense<0.000000e+00> : vector<4x256xf32>
    %11 = tpu.matmul %10, %9, %cst_5 {dimension_numbers = #tpu.dot_dimension_numbers<[1], [0], [0], [1], [0, 0, 1, 1], [], []>} : vector<4x4xf32>, vector<4x256xf32>, vector<4x256xf32> -> vector<4x256xf32>
    %c0_6 = arith.constant 0 : index
    %c0_7 = arith.constant 0 : index
    %12 = vector.load %arg4[%c0_6, %c0_7] : memref<4x1xf32, #tpu.memory_space<vmem>>, vector<4x1xf32>
    %13 = vector.broadcast %12 : vector<4x1xf32> to vector<4x256xf32>
    %14 = arith.addf %11, %13 : vector<4x256xf32>
    %15 = arith.addf %14, %1 : vector<4x256xf32>
    %c0_8 = arith.constant 0 : index
    %c0_9 = arith.constant 0 : index
    %c0_10 = arith.constant 0 : index
    %16 = vector.load %arg5[%c0_8, %c0_9, %c0_10] : memref<1x4x256xf32, #tpu.memory_space<vmem>>, vector<1x4x256xf32>
    %17 = vector.shape_cast %16 : vector<1x4x256xf32> to vector<4x256xf32>
    %18 = vector.shape_cast %15 : vector<4x256xf32> to vector<1x4x256xf32>
    tpu.vector_store %arg5[%c0_8, %c0_9, %c0_10], %18 {strides = array<i32>} : memref<1x4x256xf32, #tpu.memory_space<vmem>>, vector<1x4x256xf32>,
    return
  }
  func.func @transform_0(%arg0: i32, %arg1: i32) -> (i32, i32, i32) {
    %c0_i32 = arith.constant 0 : i32
    %c0_i32_0 = arith.constant 0 : i32
    return %arg0, %c0_i32, %arg1 : i32, i32, i32
  }
  func.func @transform_1(%arg0: i32, %arg1: i32) -> (i32, i32) {
    %c0_i32 = arith.constant 0 : i32
    %c0_i32_0 = arith.constant 0 : i32
    %c0_i32_1 = arith.constant 0 : i32
    return %c0_i32, %c0_i32_0 : i32, i32
  }
  func.func @transform_2(%arg0: i32, %arg1: i32) -> (i32, i32) {
    %c0_i32 = arith.constant 0 : i32
    %c0_i32_0 = arith.constant 0 : i32
    %c0_i32_1 = arith.constant 0 : i32
    return %c0_i32, %c0_i32_0 : i32, i32
  }
  func.func @transform_3(%arg0: i32, %arg1: i32) -> (i32, i32, i32) {
    %c0_i32 = arith.constant 0 : i32
    %c0_i32_0 = arith.constant 0 : i32
    return %arg0, %c0_i32, %arg1 : i32, i32, i32
  }
}

</mosaic_0001>

<bundles_post_ra>
// kernel: tpu_custom_call.1
= control target key start
LH: loop header
LB: loop body
LE: loop exit
PB: predicated region body
PF: predicated region fallthrough
CT: control target
= control target key end

     0   :  { %8 = vsyncpa [#allocation3], 0  ;;  %s849_s0 = inlined_call_operand.hbm [shape: f32[2,4,256], index: 0, kind: input, shape index: {}]   ;;  %s850_s1 = inlined_call_operand.vmem [shape: f32[4,4], index: 1, kind: input, shape index: {}]   ;;  %s851_s2 = inlined_call_operand.vmem [shape: f32[4,1], index: 2, kind: input, shape index: {}]   ;;  %s852_s3 = inlined_call_operand.hbm [shape: f32[2,4,256], index: 3, kind: output, shape index: {}]  }
   0x1   :  { %10 = vsyncpa [#allocation3 + $0x1], 0 }
   0x2   :  { %11 = vsyncpa [#allocation4], 0 }
   0x3   :  { %13 = vsyncpa [#allocation4 + $0x1], 0  ;;  %s663_s12 = smov 0   ;;  %s665_s13 = smov 0  }
   0x4   :  { %s667_s14 = smov 0   ;;  %s669_s15 = smov 0  }
   0x5   :  { %s671_s16 = smov 0   ;;  %s673_s17 = smov 0  }
   0x6 LB: > { %s435_s18 = sadd.s32 4294967295, %s637_s17   ;;  %s436_s19 = sadd.s32 4294967294, %s637_s17   ;;  %s637_s17 = sphi %s673_s17, %s19_s17   ;;  %s633_s16 = sphi %s671_s16, %s868_s16   ;;  %s629_s15 = sphi %s669_s15, %s867_s15   ;;  %s625_s14 = sphi %s667_s14, %s866_s14   ;;  %s621_s13 = sphi %s665_s13, %s865_s13   ;;  %s617_s12 = sphi %s663_s12, %s864_s12  }
   0x7   : > { %s31_s20 = sadd.s32 1, %s633_s16  ;;  %s40_s21 = sadd.s32 1, %s625_s14 }
   0x8   : > { %p33_p0 = scmp.ge.s32.totalorder %s31_s20, 2  ;;  %p47_p1 = scmp.ne.s32.totalorder %s625_s14, %s621_s13 }
   0x9   : > { %p48_p2 = scmp.eq.s32.totalorder %s637_s17, 0  ;;  %p53_p3 = scmp.ne.s32.totalorder %s621_s13, %s617_s12 }
   0xa   : > { %s870_s20 = smov (%p33_p0, %s31_s20), 0  ;;  %p54_p5 = scmp.eq.s32.totalorder %s435_s18, 0 }
   0xb   : > { %p704_p4 = por %p48_p2, %p47_p1  ;;  %s35_s23 = ssub.s32 %s633_s16, %s870_s20 }
   0xc   : > { %p121_p6 = scmp.eq.s32.totalorder %s435_s18, 1  ;;  %p38_p7 = scmp.eq.s32.totalorder %s35_s23, 0 }
   0xd   : > { %p710_p8 = por %p54_p5, %p53_p3  ;;  %p127_p10 = scmp.eq.s32.totalorder %s436_s19, 1 }
   0xe   : > { %p714_p9 = por %p121_p6, %p47_p1  ;;  %p467_p13 = scmp.lt.s32.totalorder %s637_s17, 2 }
   0xf   : > { %s719_s26 = scalar_select %p38_p7, %s625_s14, %s40_s21  }
  0x10   : > { %s856_s25 = scalar_select %p714_p9, 1, 0 }
  0x11   : > { %p721_p11 = por %p127_p10, %p53_p3  ;;  %s153_s28 = sand.u32 1, %s625_s14  }
  0x12   : > { %s439_s29 = sshll.u32 %s153_s28, 3  ;;  %s453_s30 = sshll.u32 %s633_s16, 7 }
  0x13   : > { %s857_s27 = scalar_select %p721_p11, 1, 0 }
  0x14   : > { %s732_s6 = scalar_lea.hbm %s849_s0, %s453_s30  ;;  %s157_s7 = scalar_lea.vmem [#allocation2], %s439_s29 }
  0x15   : > { %s167_s8 = sshll.u32 %s157_s7, 4  ;;  %p738_p0 = pnand %p467_p13, %p704_p4  ;;  %s734_s8 = int_to_ptr.vmem [resolvable:$true] %s167_s8 }
  0x16   : > { %s154_s10 = scalar_lea.sflag [#allocation3], %s153_s28  ;;  %s525_s11 = scalar_lea.hbm %s732_s6, 128 }
  0x17   : > { %p526_p3 = scmp.ne.s32.totalorder %s732_s6, %s525_s11  ;;  %p527_p5 = pneg %p738_p0 }
  0x18   : > { %s530_s21 = scalar_lea.hbm %s849_s0, 256  ;;  %p531_p4 = scmp.lt.u32.totalorder %s732_s6, %s849_s0 }
  0x19   : > { %p528_p6 = pnand %p527_p5, %p526_p3  ;;  %p532_p10 = scmp.lt.u32.totalorder %s530_s21, %s525_s11 }
  0x1a   : > { %p534_p12 = scmp.lt.u32.totalorder %s525_s11, %s732_s6 }
  0x1b   : > { %p529_p7 = pneg %p528_p6  ;;  %p533_p13 = por %p532_p10, %p531_p4 }
  0x1d   : > { %p535_p1 = por %p534_p12, %p533_p13 }
  0x1f   : > { %p536_p2 = pnand %p535_p1, %p529_p7 }
  0x21   : > { %539 = shalt.err (!%p536_p2)
}
  0x22   : > { %s540_s28 = scalar_lea.vmem %s734_s8, 128  ;;  %s639_s29 = smov [#allocation2]  }
  0x23   : > { %p541_p3 = scmp.ne.s32.totalorder %s734_s8, %s540_s28  ;;  %s545_s30 = sshll.u32 %s639_s29, 4  ;;  %s546_s30 = int_to_ptr.vmem [resolvable:$false] %s545_s30 }
  0x24   : > { %s547_s4 = scalar_lea.vmem %s546_s30, 256  ;;  %p548_p9 = scmp.lt.s32.totalorder %s734_s8, %s546_s30 }
  0x25   : > { %p543_p6 = pnand %p541_p3, %p527_p5  ;;  %p549_p4 = scmp.lt.s32.totalorder %s547_s4, %s540_s28 }
  0x27   : > { %p544_p11 = pneg %p543_p6  ;;  %p550_p10 = por %p549_p4, %p548_p9 }
  0x29   : > { %p551_p12 = pnand %p550_p10, %p544_p11 }
  0x2b   : > { %554 = shalt.err (!%p551_p12)
}
  0x2c   : > { %462 = dma.hbm_to_vmem [thread:$0]  (!%p738_p0), %s732_s6, 128, %s734_s8, %s154_s10  }
  0x2d   : > { %p859_p1 = scmp.lt.s32.totalorder %s637_s17, 3  ;;  %p860_p2 = scmp.ge.s32.totalorder %s637_s17, 1 }
  0x2f   : > { %p173_p5 = pnand %p860_p2, %p859_p1 }
  0x30   : > { %s774_s5 = sand.u32 (!%p173_p5), 1, %s621_s13  }
  0x31   : > { %176 = sbr.rel (%p173_p5) target bundleno = 329 (0x149), region = 32  ;;  %s443_s7 = sshll.u32 (!%p173_p5), %s774_s5, 3 }
  0x32   : > { %s179_s11 = scalar_lea.sflag (!%p173_p5), [#allocation3], %s774_s5  ;;  %s182_s9 = scalar_lea.vmem (!%p173_p5), [#allocation2], %s443_s7 }
  0x38   : > { %608 = dma.done.wait (%p710_p8), %s179_s11, 128  }
  0x39   : > { %610 = vsyncadd (%p710_p8), %s179_s11, 4294967168  ;;  %v640_v0 = vmov 0.0   ;;  %v641_v1 = vmov 0   ;;  %v207_v2 = vld [vmem:[%s182_s9] sm:$0xff]  ;;  %vm212_vm0 = vcmask 1043456   ;;  %vm245_vm1 = vcmask 31744  }
  0x3a   : > { %317 = vmatprep.mubr.f32.mxu0 %v640_v0  ;;  %519 = vset.pattern.permute.xlu0 %v641_v1  ;;  %v237_v3 = vld [vmem:[%s851_s2] sm:$0xf]  ;;  %v208_v4 = vmul.f32 %v207_v2, %v207_v2  ;;  %v325_v30 = vcombine.high %v207_v2, %v207_v2  ;;  %s454_s18 = sshll.u32 %s629_s15, 7  ;;  %s204_s19 = scalar_lea.vmem [#allocation5], %s443_s7 }
  0x3b   : > { %240 = vperm.xlu0 %519, %v237_v3   ;;  %v236_v27 = vld [vmem:[%s850_s1] sm:$0xf]  ;;  %s351_s21 = sshll.u32 %s204_s19, 4  ;;  %s800_s28 = scalar_lea.hbm %s852_s3, %s454_s18  ;;  %s802_s21 = int_to_ptr.vmem [resolvable:$true] %s351_s21 }
  0x3c   : > { %v210_v5 = vcombine.high %v208_v4, %v208_v4  ;;  %v213_v6 = vsel %vm212_vm0, %v208_v4, 0.0  ;;  %s335_s29 = scalar_lea.sflag [#allocation4], %s774_s5  ;;  %s555_s30 = scalar_lea.vmem %s802_s21, 128 }
  0x3d   : > { %v214_v7 = vrot.slane %v213_v6, 4  ;;  %p556_p8 = scmp.ne.s32.totalorder %s802_s21, %s555_s30  ;;  %p861_p9 = scmp.ne.s32.totalorder %s856_s25, 0 }
  0x3e   : > { %v220_v8 = vsel %vm212_vm0, %v210_v5, 0.0  ;;  %s642_s15 = smov [#allocation5]  }
  0x3f   : > { %v215_v9 = vadd.f32 %v214_v7, %v213_v6  ;;  %v221_v10 = vrot.slane %v220_v8, 4  ;;  %p557_p11 = pnand %p556_p8, %p861_p9  ;;  %s559_s4 = sshll.u32 %s642_s15, 4  ;;  %s560_s4 = int_to_ptr.vmem [resolvable:$false] %s559_s4 }
  0x40   : > { %s561_s7 = scalar_lea.vmem %s560_s4, 256  ;;  %p562_p7 = scmp.lt.s32.totalorder %s802_s21, %s560_s4 }
  0x41   : > { %v216_v11 = vrot.slane %v215_v9, 2  ;;  %v222_v12 = vadd.f32 %v221_v10, %v220_v8  ;;  %p558_p0 = pneg %p557_p11  ;;  %p563_p13 = scmp.lt.s32.totalorder %s561_s7, %s555_s30 }
  0x43   : > { %v217_v13 = vadd.f32 %v216_v11, %v215_v9  ;;  %v223_v14 = vrot.slane %v222_v12, 2  ;;  %p564_p3 = por %p563_p13, %p562_p7 }
  0x45   : > { %v218_v15 = vrot.slane %v217_v13, 1  ;;  %v224_v16 = vadd.f32 %v223_v14, %v222_v12  ;;  %p565_p6 = pnand %p564_p3, %p558_p0 }
  0x47   : > { %v219_v17 = vadd.f32 %v218_v15, %v217_v13  ;;  %v225_v18 = vrot.slane %v224_v16, 1 }
  0x49   : > { %v226_v19 = vadd.f32 %v225_v18, %v224_v16  ;;  %v227_v20 = vmax.f32 %v219_v17, 1e-24 }
  0x4b   : > { %v228_v21 = vmax.f32 %v226_v19, 1e-24  ;;  %521 = vrsqrt.f32 %v227_v20 }
  0x4d   : > { %523 = vrsqrt.f32 %v228_v21 }
  0x55   : > { %v522_v22 = vpop.eup %521 }
  0x57   : > { %v524_v23 = vpop.eup %523 }
  0x58   : > { %v233_v24 = vcombine.low %v522_v22, %v524_v23 }
  0x5a   : > { %v235_v25 = vmul.f32 %v233_v24, %v207_v2 }
  0x5c   : > { %v244_v26 = vcombine.high %v235_v25, %v235_v25 }
  0x5e   : > { %445 = vmatprep.subr.msk.mxu0 %vm212_vm0, %v244_v26 }
  0x5f   : > { %446 = vmatpush1.msk.msra.mxu0 %vm212_vm0, %v235_v25 }
  0x60   : > { %447 = vmatmul.mubr.msk.f32.vlgmr.msra.gmra.mrb[0].mxu0 %vm245_vm1, %v236_v27 }
  0xba   : > { %v241_v28 = vpop.permute.xlu0 %240 }
 0x133   : > { %v319_v29 = vpop.f32.mrb[0].mxu0 }
 0x134   : > { %v320_v31 = vadd.f32 %v319_v29, %v241_v28  ;;  %v321_v32 = vpop.f32.mrb[1].mxu0 }
 0x135   : > { %v322_v33 = vadd.f32 %v321_v32, %v241_v28 }
 0x136   : > { %v327_v34 = vadd.f32 %v320_v31, %v207_v2 }
 0x137   : > { %v328_v35 = vadd.f32 %v325_v30, %v322_v33 }
 0x139   : > { %v331_v36 = vcombine.low %v327_v34, %v328_v35 }
 0x13b   : > { %333 = vst [vmem:[%s204_s19] sm:$0xff] %v331_v36 }
 0x13c   : > { %568 = shalt.err (!%p565_p6)
}
 0x13d   : > { %s569_s5 = scalar_lea.hbm %s800_s28, 128  ;;  %s573_s6 = scalar_lea.hbm %s852_s3, 256 }
 0x13e   : > { %p570_p4 = scmp.ne.s32.totalorder %s800_s28, %s569_s5  ;;  %p574_p1 = scmp.lt.u32.totalorder %s800_s28, %s852_s3 }
 0x13f   : > { %p575_p2 = scmp.lt.u32.totalorder %s573_s6, %s569_s5  ;;  %p577_p8 = scmp.lt.u32.totalorder %s569_s5, %s800_s28 }
 0x140   : > { %p571_p10 = pnand %p570_p4, %p861_p9 }
 0x141   : > { %p576_p5 = por %p575_p2, %p574_p1 }
 0x142   : > { %p572_p12 = pneg %p571_p10 }
 0x143   : > { %p578_p11 = por %p577_p8, %p576_p5 }
 0x145   : > { %p579_p0 = pnand %p578_p11, %p572_p12 }
 0x147   : > { %582 = shalt.err (!%p579_p0)
}
 0x148   : > { %457 = dma.vmem_to_hbm [thread:$0]  (%p861_p9), %s802_s21, 128, %s800_s28, %s335_s29  }
 0x149 PF: > { %s363_s10 = sand.u32 1, %s617_s12   ;;  %p862_p7 = scmp.ne.s32.totalorder %s857_s27, 0 }
 0x14a   : > { %p863_p13 = scmp.ge.s32.totalorder %s637_s17, 2  ;;  %s364_s18 = scalar_lea.sflag [#allocation4], %s363_s10 }
 0x14c   : > { %p464_p3 = pnand %p863_p13, %p862_p7 }
 0x14e   : > { %612 = dma.done.wait (!%p464_p3), %s364_s18, 128  }
 0x14f   : > { %614 = vsyncadd (!%p464_p3), %s364_s18, 4294967168  ;;  %s19_s17 = sadd.s32 1, %s637_s17   ;;  %s864_s12 = smov %s621_s13 }
 0x150   : > { %p16_p6 = scmp.ge.s32.totalorder %s19_s17, 4   ;;  %s865_s13 = smov %s625_s14 }
 0x151   : > { %s866_s14 = smov %s719_s26  ;;  %s867_s15 = smov %s633_s16 }
 0x152   : > { %s868_s16 = smov %s870_s20  ;;  %18 = sbr.rel (!%p16_p6) target bundleno = 6 (0x6), region = 77 }
 0x159   :  { %369 = vsyncpa [#allocation3], 1 }
 0x15a   :  { %371 = vsyncpa [#allocation3 + $0x1], 1 }
 0x15b   :  { %372 = vsyncpa [#allocation4], 1 }
 0x15c   :  { %374 = vsyncpa [#allocation4 + $0x1], 1 }

</bundles_post_ra>
